<compile_context>
chip_gen: v5e
topology: v5e:2x2
jax: 0.10.0
libtpu: 0.0.40
codegen_flags: <defaults>
</compile_context>

<pallas_src>
import jax
import jax.numpy as jnp
from jax.experimental import pallas as pl
from jax.experimental.pallas import tpu as pltpu

EPS = 1e-5  # nn.LayerNorm default


def dnn_kernel(x_ref, w_ref, p_ref, o_ref, acc_ref):
    k = pl.program_id(1)

    @pl.when(k == 0)
    def _init():
        acc_ref[...] = jnp.zeros_like(acc_ref)

    # MXU matmul in native operand dtype, f32 accumulation.
    acc_ref[...] += jnp.dot(x_ref[...], w_ref[...],
                            preferred_element_type=jnp.float32)

    @pl.when(k == pl.num_programs(1) - 1)
    def _finalize():
        p = p_ref[...]                       # (3, out_f) f32: bias, gamma, beta
        h = acc_ref[...] + p[0:1, :]
        # Two independent cross-lane reductions (no serial mean->center->var chain).
        mean = jnp.mean(h, axis=-1, keepdims=True)
        msq = jnp.mean(h * h, axis=-1, keepdims=True)
        var = jnp.maximum(msq - mean * mean, 0.0)
        hn = (h - mean) * jax.lax.rsqrt(var + EPS)
        hn = hn * p[1:2, :] + p[2:3, :]
        # Tanh on the EUP; dropout is identity at inference.
        o_ref[...] = jnp.tanh(hn).astype(o_ref.dtype)


def _round_up(x, m):
    return ((x + m - 1) // m) * m


def _vmem_budget_bytes():
    """~80% of per-core VMEM capacity (headroom for compiler scratch/semaphores)."""
    cap = None
    try:
        info = pltpu.get_tpu_info()
        cap = int(getattr(info, "vmem_capacity_bytes", 0)) or None
    except Exception:
        cap = None
    if cap is None or cap <= 0:
        cap = 64 << 20  # conservative fallback (valid on every generation)
    return (cap * 4) // 5


def dnn_forward(x, w_t, b, gamma, beta, *, max_tm=1024):
    """x: [..., in_features]; w_t: [in_features, out_features] (= PyTorch W.T)."""
    orig_shape = x.shape
    in_f = int(orig_shape[-1])
    out_f = int(w_t.shape[1])
    x2 = x.reshape(-1, in_f)
    n = int(x2.shape[0])

    x_item = jnp.dtype(x2.dtype).itemsize
    w_item = jnp.dtype(w_t.dtype).itemsize
    pack = {4: 8, 2: 16, 1: 32}.get(x_item, 8)   # dtype-aware sublane pack

    budget = _vmem_budget_bytes()

    # --- K (in_features) tiling: bound resident-weight VMEM independent of in_f.
    if in_f * out_f * w_item <= budget // 2:
        tk = in_f
    else:
        tk = 0
        for cand in (2048, 1024, 512, 256, 128):
            if in_f % cand == 0 and 2 * cand * out_f * w_item <= budget // 2:
                tk = cand
                break
        if tk == 0:
            tk = in_f  # see TODO(synk) on K padding
    k_blocks = pl.cdiv(in_f, tk)
    w_bufs = 1 if k_blocks == 1 else 2           # single-buffer the resident weight

    # --- Row tile from the VMEM budget.
    fixed = w_bufs * tk * out_f * w_item + 8 * max(out_f, 128) * 4 + (4 << 20)
    per_row = 2 * tk * x_item + 2 * out_f * x_item + out_f * 4   # x, out (dbl-buf), acc
    tm = (budget - fixed) // max(per_row, 1)
    tm = min(tm, max_tm, _round_up(n, pack))
    tm = max(pack, (tm // pack) * pack)

    # v7x has 2 TensorCores: keep >= 2 row blocks so the "parallel" axis splits.
    n_blocks = pl.cdiv(n, tm)
    while n_blocks < 2 and tm > pack:
        tm = max(pack, ((tm // 2) // pack) * pack)
        n_blocks = pl.cdiv(n, tm)

    vmem_limit = int(min(budget, max(fixed + tm * per_row, 16 << 20)))

    # Pack bias / gamma / beta into one (3, out_f) f32 array (one tiny DMA).
    params = jnp.stack([b, gamma, beta]).astype(jnp.float32)

    def _build(use_single_buffer):
        sb = {"pipeline_mode": pl.Buffered(1)} if use_single_buffer else {}
        w_kwargs = sb if w_bufs == 1 else {}
        return pl.pallas_call(
            dnn_kernel,
            out_shape=jax.ShapeDtypeStruct((n, out_f), x.dtype),
            grid_spec=pltpu.PrefetchScalarGridSpec(
                num_scalar_prefetch=0,
                grid=(n_blocks, k_blocks),
                in_specs=[
                    pl.BlockSpec((tm, tk), lambda i, k: (i, k)),              # x rows
                    pl.BlockSpec((tk, out_f), lambda i, k: (k, 0), **w_kwargs),  # weight
                    pl.BlockSpec((3, out_f), lambda i, k: (0, 0), **sb),      # b/gamma/beta
                ],
                out_specs=pl.BlockSpec((tm, out_f), lambda i, k: (i, 0)),
                scratch_shapes=[pltpu.VMEM((tm, out_f), jnp.float32)],        # f32 acc
            ),
            compiler_params=pltpu.CompilerParams(
                dimension_semantics=("parallel", "arbitrary"),
                vmem_limit_bytes=vmem_limit,
            ),
        )

    try:
        out = _build(True)(x2, w_t, params)
    except Exception:
        # Fallback in case pipeline_mode=Buffered(1) is unsupported on this build.
        out = _build(False)(x2, w_t, params)

    return out.reshape(*orig_shape[:-1], out_f)


if __name__ == "__main__":
    key = jax.random.PRNGKey(0)
    # Small shapes; out_features=128 keeps the output last dim lane-dense.
    batch, seq, in_features, out_features = 2, 8, 32, 128

    k_x, k_w, k_b = jax.random.split(key, 3)
    x = jax.random.normal(k_x, (batch, seq, in_features), dtype=jnp.float32)
    # Deterministic synthetic params (shapes from nn.Linear / nn.LayerNorm).
    w = jax.random.normal(k_w, (out_features, in_features), dtype=jnp.float32) * 0.1
    b = jax.random.normal(k_b, (out_features,), dtype=jnp.float32) * 0.1
    gamma = jnp.ones((out_features,), dtype=jnp.float32)
    beta = jnp.zeros((out_features,), dtype=jnp.float32)

    out = dnn_forward(x, w.T, b, gamma, beta)
    jax.block_until_ready(out)

    # Reference in plain JAX for sanity.
    h = x @ w.T + b
    mu = h.mean(-1, keepdims=True)
    var = ((h - mu) ** 2).mean(-1, keepdims=True)
    ref = jnp.tanh((h - mu) / jnp.sqrt(var + EPS) * gamma + beta)
    assert out.shape == ref.shape, "shape mismatch vs reference"
    assert jnp.allclose(out, ref, atol=2e-5, rtol=2e-5), "mismatch vs reference"

    print("KERNEL_OK")
</pallas_src>

<mosaic_0001>
module attributes {stable_mosaic.version = 11 : i64} {
  func.func @dnn_kernel(%arg0: i32, %arg1: i32, %arg2: memref<8x32xf32, #tpu.memory_space<vmem>>, %arg3: memref<32x128xf32, #tpu.memory_space<vmem>>, %arg4: memref<3x128xf32, #tpu.memory_space<vmem>>, %arg5: memref<8x128xf32, #tpu.memory_space<vmem>>, %arg6: memref<8x128xf32, #tpu.memory_space<vmem>>) attributes {dimension_semantics = [#tpu.dimension_semantics<parallel>, #tpu.dimension_semantics<arbitrary>], iteration_bounds = array<i64: 2, 1>, scalar_prefetch = 0 : i64, scratch_operands = 1 : i64, tpu.core_type = #tpu.core_type<tc>, window_params = [{transform_indices = @transform_0, window_bounds = array<i64: 8, 32>}, {pipeline_mode = #tpu.pipeline_mode<synchronous>, transform_indices = @transform_1, window_bounds = array<i64: 32, 128>}, {pipeline_mode = #tpu.pipeline_mode<synchronous>, transform_indices = @transform_2, window_bounds = array<i64: 3, 128>}, {transform_indices = @transform_3, window_bounds = array<i64: 8, 128>}]} {
    %c0_i32 = arith.constant 0 : i32
    %0 = arith.cmpi eq, %arg1, %c0_i32 : i32
    %1 = arith.extui %0 : i1 to i32
    %c0_i32_0 = arith.constant 0 : i32
    %2 = arith.cmpi ne, %1, %c0_i32_0 : i32
    scf.if %2 {
      %cst_10 = arith.constant 0.000000e+00 : f32
      %12 = vector.broadcast %cst_10 : f32 to vector<8x128xf32>
      %c0_11 = arith.constant 0 : index
      %c0_12 = arith.constant 0 : index
      %13 = vector.load %arg6[%c0_11, %c0_12] : memref<8x128xf32, #tpu.memory_space<vmem>>, vector<8x128xf32>
      tpu.vector_store %arg6[%c0_11, %c0_12], %12 {strides = array<i32>} : memref<8x128xf32, #tpu.memory_space<vmem>>, vector<8x128xf32>,
    } else {
    }
    %c0 = arith.constant 0 : index
    %c0_1 = arith.constant 0 : index
    %3 = vector.load %arg6[%c0, %c0_1] : memref<8x128xf32, #tpu.memory_space<vmem>>, vector<8x128xf32>
    %c0_2 = arith.constant 0 : index
    %c0_3 = arith.constant 0 : index
    %4 = vector.load %arg2[%c0_2, %c0_3] : memref<8x32xf32, #tpu.memory_space<vmem>>, vector<8x32xf32>
    %c0_4 = arith.constant 0 : index
    %c0_5 = arith.constant 0 : index
    %5 = vector.load %arg3[%c0_4, %c0_5] : memref<32x128xf32, #tpu.memory_space<vmem>>, vector<32x128xf32>
    %cst = arith.constant dense<0.000000e+00> : vector<8x128xf32>
    %6 = tpu.matmul %4, %5, %cst {dimension_numbers = #tpu.dot_dimension_numbers<[1], [0], [0], [1], [0, 0, 1, 1], [], []>} : vector<8x32xf32>, vector<32x128xf32>, vector<8x128xf32> -> vector<8x128xf32>
    %7 = arith.addf %3, %6 : vector<8x128xf32>
    %c0_6 = arith.constant 0 : index
    %c0_7 = arith.constant 0 : index
    %8 = vector.load %arg6[%c0_6, %c0_7] : memref<8x128xf32, #tpu.memory_space<vmem>>, vector<8x128xf32>
    tpu.vector_store %arg6[%c0_6, %c0_7], %7 {strides = array<i32>} : memref<8x128xf32, #tpu.memory_space<vmem>>, vector<8x128xf32>,
    %c0_i32_8 = arith.constant 0 : i32
    %9 = arith.cmpi eq, %arg1, %c0_i32_8 : i32
    %10 = arith.extui %9 : i1 to i32
    %c0_i32_9 = arith.constant 0 : i32
    %11 = arith.cmpi ne, %10, %c0_i32_9 : i32
    scf.if %11 {
      %c0_10 = arith.constant 0 : index
      %c0_11 = arith.constant 0 : index
      %12 = vector.load %arg4[%c0_10, %c0_11] : memref<3x128xf32, #tpu.memory_space<vmem>>, vector<3x128xf32>
      %c0_12 = arith.constant 0 : index
      %c0_13 = arith.constant 0 : index
      %13 = vector.load %arg6[%c0_12, %c0_13] : memref<8x128xf32, #tpu.memory_space<vmem>>, vector<8x128xf32>
      %14 = vector.extract_strided_slice %12 {offsets = [0, 0], sizes = [1, 128], strides = [1, 1]} : vector<3x128xf32> to vector<1x128xf32>
      %15 = vector.broadcast %14 : vector<1x128xf32> to vector<8x128xf32>
      %16 = arith.addf %13, %15 : vector<8x128xf32>
      %cst_14 = arith.constant dense<0.000000e+00> : vector<8xf32>
      %17 = vector.multi_reduction <add>, %16, %cst_14 [1] : vector<8x128xf32> to vector<8xf32>
      %18 = vector.shape_cast %17 : vector<8xf32> to vector<8x1xf32>
      %cst_15 = arith.constant 1.280000e+02 : f32
      %19 = vector.broadcast %cst_15 : f32 to vector<8x1xf32>
      %20 = arith.divf %18, %19 : vector<8x1xf32>
      %21 = arith.mulf %16, %16 : vector<8x128xf32>
      %cst_16 = arith.constant dense<0.000000e+00> : vector<8xf32>
      %22 = vector.multi_reduction <add>, %21, %cst_16 [1] : vector<8x128xf32> to vector<8xf32>
      %23 = vector.shape_cast %22 : vector<8xf32> to vector<8x1xf32>
      %cst_17 = arith.constant 1.280000e+02 : f32
      %24 = vector.broadcast %cst_17 : f32 to vector<8x1xf32>
      %25 = arith.divf %23, %24 : vector<8x1xf32>
      %26 = arith.mulf %20, %20 : vector<8x1xf32>
      %27 = arith.subf %25, %26 : vector<8x1xf32>
      %cst_18 = arith.constant 0.000000e+00 : f32
      %28 = vector.broadcast %cst_18 : f32 to vector<8x1xf32>
      %29 = arith.maximumf %27, %28 : vector<8x1xf32>
      %30 = vector.broadcast %20 : vector<8x1xf32> to vector<8x128xf32>
      %31 = arith.subf %16, %30 : vector<8x128xf32>
      %cst_19 = arith.constant 9.99999974E-6 : f32
      %32 = vector.broadcast %cst_19 : f32 to vector<8x1xf32>
      %33 = arith.addf %29, %32 : vector<8x1xf32>
      %34 = math.rsqrt %33 : vector<8x1xf32>
      %35 = vector.broadcast %34 : vector<8x1xf32> to vector<8x128xf32>
      %36 = arith.mulf %31, %35 : vector<8x128xf32>
      %37 = vector.extract_strided_slice %12 {offsets = [1, 0], sizes = [1, 128], strides = [1, 1]} : vector<3x128xf32> to vector<1x128xf32>
      %38 = vector.broadcast %37 : vector<1x128xf32> to vector<8x128xf32>
      %39 = arith.mulf %36, %38 : vector<8x128xf32>
      %40 = vector.extract_strided_slice %12 {offsets = [2, 0], sizes = [1, 128], strides = [1, 1]} : vector<3x128xf32> to vector<1x128xf32>
      %41 = vector.broadcast %40 : vector<1x128xf32> to vector<8x128xf32>
      %42 = arith.addf %39, %41 : vector<8x128xf32>
      %43 = math.tanh %42 : vector<8x128xf32>
      %c0_20 = arith.constant 0 : index
      %c0_21 = arith.constant 0 : index
      %44 = vector.load %arg5[%c0_20, %c0_21] : memref<8x128xf32, #tpu.memory_space<vmem>>, vector<8x128xf32>
      tpu.vector_store %arg5[%c0_20, %c0_21], %43 {strides = array<i32>} : memref<8x128xf32, #tpu.memory_space<vmem>>, vector<8x128xf32>,
    } else {
    }
    return
  }
  func.func @transform_0(%arg0: i32, %arg1: i32) -> (i32, i32) {
    %c0_i32 = arith.constant 0 : i32
    return %arg0, %arg1 : i32, i32
  }
  func.func @transform_1(%arg0: i32, %arg1: i32) -> (i32, i32) {
    %c0_i32 = arith.constant 0 : i32
    %c0_i32_0 = arith.constant 0 : i32
    return %arg1, %c0_i32 : i32, i32
  }
  func.func @transform_2(%arg0: i32, %arg1: i32) -> (i32, i32) {
    %c0_i32 = arith.constant 0 : i32
    %c0_i32_0 = arith.constant 0 : i32
    %c0_i32_1 = arith.constant 0 : i32
    return %c0_i32, %c0_i32_0 : i32, i32
  }
  func.func @transform_3(%arg0: i32, %arg1: i32) -> (i32, i32) {
    %c0_i32 = arith.constant 0 : i32
    %c0_i32_0 = arith.constant 0 : i32
    return %arg0, %c0_i32 : i32, i32
  }
}

module attributes {stable_mosaic.version = 11 : i64} {
  func.func @dnn_kernel(%arg0: i32, %arg1: i32, %arg2: memref<8x32xf32, #tpu.memory_space<vmem>>, %arg3: memref<32x128xf32, #tpu.memory_space<vmem>>, %arg4: memref<3x128xf32, #tpu.memory_space<vmem>>, %arg5: memref<8x128xf32, #tpu.memory_space<vmem>>, %arg6: memref<8x128xf32, #tpu.memory_space<vmem>>) attributes {dimension_semantics = [#tpu.dimension_semantics<parallel>, #tpu.dimension_semantics<arbitrary>], iteration_bounds = array<i64: 2, 1>, scalar_prefetch = 0 : i64, scratch_operands = 1 : i64, tpu.core_type = #tpu.core_type<tc>, window_params = [{transform_indices = @transform_0, window_bounds = array<i64: 8, 32>}, {transform_indices = @transform_1, window_bounds = array<i64: 32, 128>}, {pipeline_mode = #tpu.pipeline_mode<synchronous>, transform_indices = @transform_2, window_bounds = array<i64: 3, 128>}, {transform_indices = @transform_3, window_bounds = array<i64: 8, 128>}]} {
    %c0_i32 = arith.constant 0 : i32
    %0 = arith.cmpi eq, %arg1, %c0_i32 : i32
    %1 = arith.extui %0 : i1 to i32
    %c0_i32_0 = arith.constant 0 : i32
    %2 = arith.cmpi ne, %1, %c0_i32_0 : i32
    scf.if %2 {
      %cst_10 = arith.constant 0.000000e+00 : f32
      %12 = vector.broadcast %cst_10 : f32 to vector<8x128xf32>
      %c0_11 = arith.constant 0 : index
      %c0_12 = arith.constant 0 : index
      %13 = vector.load %arg6[%c0_11, %c0_12] : memref<8x128xf32, #tpu.memory_space<vmem>>, vector<8x128xf32>
      tpu.vector_store %arg6[%c0_11, %c0_12], %12 {strides = array<i32>} : memref<8x128xf32, #tpu.memory_space<vmem>>, vector<8x128xf32>,
    } else {
    }
    %c0 = arith.constant 0 : index
    %c0_1 = arith.constant 0 : index
    %3 = vector.load %arg6[%c0, %c0_1] : memref<8x128xf32, #tpu.memory_space<vmem>>, vector<8x128xf32>
    %c0_2 = arith.constant 0 : index
    %c0_3 = arith.constant 0 : index
    %4 = vector.load %arg2[%c0_2, %c0_3] : memref<8x32xf32, #tpu.memory_space<vmem>>, vector<8x32xf32>
    %c0_4 = arith.constant 0 : index
    %c0_5 = arith.constant 0 : index
    %5 = vector.load %arg3[%c0_4, %c0_5] : memref<32x128xf32, #tpu.memory_space<vmem>>, vector<32x128xf32>
    %cst = arith.constant dense<0.000000e+00> : vector<8x128xf32>
    %6 = tpu.matmul %4, %5, %cst {dimension_numbers = #tpu.dot_dimension_numbers<[1], [0], [0], [1], [0, 0, 1, 1], [], []>} : vector<8x32xf32>, vector<32x128xf32>, vector<8x128xf32> -> vector<8x128xf32>
    %7 = arith.addf %3, %6 : vector<8x128xf32>
    %c0_6 = arith.constant 0 : index
    %c0_7 = arith.constant 0 : index
    %8 = vector.load %arg6[%c0_6, %c0_7] : memref<8x128xf32, #tpu.memory_space<vmem>>, vector<8x128xf32>
    tpu.vector_store %arg6[%c0_6, %c0_7], %7 {strides = array<i32>} : memref<8x128xf32, #tpu.memory_space<vmem>>, vector<8x128xf32>,
    %c0_i32_8 = arith.constant 0 : i32
    %9 = arith.cmpi eq, %arg1, %c0_i32_8 : i32
    %10 = arith.extui %9 : i1 to i32
    %c0_i32_9 = arith.constant 0 : i32
    %11 = arith.cmpi ne, %10, %c0_i32_9 : i32
    scf.if %11 {
      %c0_10 = arith.constant 0 : index
      %c0_11 = arith.constant 0 : index
      %12 = vector.load %arg4[%c0_10, %c0_11] : memref<3x128xf32, #tpu.memory_space<vmem>>, vector<3x128xf32>
      %c0_12 = arith.constant 0 : index
      %c0_13 = arith.constant 0 : index
      %13 = vector.load %arg6[%c0_12, %c0_13] : memref<8x128xf32, #tpu.memory_space<vmem>>, vector<8x128xf32>
      %14 = vector.extract_strided_slice %12 {offsets = [0, 0], sizes = [1, 128], strides = [1, 1]} : vector<3x128xf32> to vector<1x128xf32>
      %15 = vector.broadcast %14 : vector<1x128xf32> to vector<8x128xf32>
      %16 = arith.addf %13, %15 : vector<8x128xf32>
      %cst_14 = arith.constant dense<0.000000e+00> : vector<8xf32>
      %17 = vector.multi_reduction <add>, %16, %cst_14 [1] : vector<8x128xf32> to vector<8xf32>
      %18 = vector.shape_cast %17 : vector<8xf32> to vector<8x1xf32>
      %cst_15 = arith.constant 1.280000e+02 : f32
      %19 = vector.broadcast %cst_15 : f32 to vector<8x1xf32>
      %20 = arith.divf %18, %19 : vector<8x1xf32>
      %21 = arith.mulf %16, %16 : vector<8x128xf32>
      %cst_16 = arith.constant dense<0.000000e+00> : vector<8xf32>
      %22 = vector.multi_reduction <add>, %21, %cst_16 [1] : vector<8x128xf32> to vector<8xf32>
      %23 = vector.shape_cast %22 : vector<8xf32> to vector<8x1xf32>
      %cst_17 = arith.constant 1.280000e+02 : f32
      %24 = vector.broadcast %cst_17 : f32 to vector<8x1xf32>
      %25 = arith.divf %23, %24 : vector<8x1xf32>
      %26 = arith.mulf %20, %20 : vector<8x1xf32>
      %27 = arith.subf %25, %26 : vector<8x1xf32>
      %cst_18 = arith.constant 0.000000e+00 : f32
      %28 = vector.broadcast %cst_18 : f32 to vector<8x1xf32>
      %29 = arith.maximumf %27, %28 : vector<8x1xf32>
      %30 = vector.broadcast %20 : vector<8x1xf32> to vector<8x128xf32>
      %31 = arith.subf %16, %30 : vector<8x128xf32>
      %cst_19 = arith.constant 9.99999974E-6 : f32
      %32 = vector.broadcast %cst_19 : f32 to vector<8x1xf32>
      %33 = arith.addf %29, %32 : vector<8x1xf32>
      %34 = math.rsqrt %33 : vector<8x1xf32>
      %35 = vector.broadcast %34 : vector<8x1xf32> to vector<8x128xf32>
      %36 = arith.mulf %31, %35 : vector<8x128xf32>
      %37 = vector.extract_strided_slice %12 {offsets = [1, 0], sizes = [1, 128], strides = [1, 1]} : vector<3x128xf32> to vector<1x128xf32>
      %38 = vector.broadcast %37 : vector<1x128xf32> to vector<8x128xf32>
      %39 = arith.mulf %36, %38 : vector<8x128xf32>
      %40 = vector.extract_strided_slice %12 {offsets = [2, 0], sizes = [1, 128], strides = [1, 1]} : vector<3x128xf32> to vector<1x128xf32>
      %41 = vector.broadcast %40 : vector<1x128xf32> to vector<8x128xf32>
      %42 = arith.addf %39, %41 : vector<8x128xf32>
      %43 = math.tanh %42 : vector<8x128xf32>
      %c0_20 = arith.constant 0 : index
      %c0_21 = arith.constant 0 : index
      %44 = vector.load %arg5[%c0_20, %c0_21] : memref<8x128xf32, #tpu.memory_space<vmem>>, vector<8x128xf32>
      tpu.vector_store %arg5[%c0_20, %c0_21], %43 {strides = array<i32>} : memref<8x128xf32, #tpu.memory_space<vmem>>, vector<8x128xf32>,
    } else {
    }
    return
  }
  func.func @transform_0(%arg0: i32, %arg1: i32) -> (i32, i32) {
    %c0_i32 = arith.constant 0 : i32
    return %arg0, %arg1 : i32, i32
  }
  func.func @transform_1(%arg0: i32, %arg1: i32) -> (i32, i32) {
    %c0_i32 = arith.constant 0 : i32
    %c0_i32_0 = arith.constant 0 : i32
    return %arg1, %c0_i32 : i32, i32
  }
  func.func @transform_2(%arg0: i32, %arg1: i32) -> (i32, i32) {
    %c0_i32 = arith.constant 0 : i32
    %c0_i32_0 = arith.constant 0 : i32
    %c0_i32_1 = arith.constant 0 : i32
    return %c0_i32, %c0_i32_0 : i32, i32
  }
  func.func @transform_3(%arg0: i32, %arg1: i32) -> (i32, i32) {
    %c0_i32 = arith.constant 0 : i32
    %c0_i32_0 = arith.constant 0 : i32
    return %arg0, %c0_i32 : i32, i32
  }
}

</mosaic_0001>

<bundles_post_ra>
// kernel: tpu_custom_call.1
= control target key start
LH: loop header
LB: loop body
LE: loop exit
PB: predicated region body
PF: predicated region fallthrough
CT: control target
= control target key end

     0   :  { %8 = vsyncpa [#allocation4], 0  ;;  %s900_s0 = inlined_call_operand.hbm [shape: f32[16,32], index: 0, kind: input, shape index: {}]   ;;  %s901_s1 = inlined_call_operand.hbm [shape: f32[32,128], index: 1, kind: input, shape index: {}]   ;;  %s902_s2 = inlined_call_operand.hbm [shape: f32[3,128], index: 2, kind: input, shape index: {}]   ;;  %s903_s3 = inlined_call_operand.hbm [shape: f32[16,128], index: 3, kind: output, shape index: {}]  }
   0x1   :  { %10 = vsyncpa [#allocation4 + $0x1], 0 }
   0x2   :  { %11 = vsyncpa [#allocation7], 0 }
   0x3   :  { %12 = vsyncpa [#allocation5], 0 }
   0x4   :  { %14 = vsyncpa [#allocation5 + $0x1], 0  ;;  %s752_s12 = smov 0   ;;  %s754_s13 = smov 0  }
   0x5   :  { %s756_s14 = smov 0   ;;  %s758_s15 = smov 0  }
   0x6   :  { %s760_s16 = smov 0   ;;  %s762_s17 = smov 0  }
   0x7 LB: > { %s439_s18 = sadd.s32 4294967295, %s725_s17   ;;  %p441_p0 = scmp.ge.s32.totalorder %s725_s17, 1  ;;  %s725_s17 = sphi %s762_s17, %s20_s17   ;;  %s721_s16 = sphi %s760_s16, %s913_s16   ;;  %s717_s15 = sphi %s758_s15, %s912_s15   ;;  %s713_s14 = sphi %s756_s14, %s911_s14   ;;  %s709_s13 = sphi %s754_s13, %s910_s13   ;;  %s705_s12 = sphi %s752_s12, %s909_s12  }
   0x8   : > { %p786_p1 = scmp.eq.s32.totalorder %s439_s18, 0  ;;  %p138_p2 = scmp.lt.s32.totalorder %s725_s17, 3 }
   0x9   : > { %s152_s22 = sshll.u32 %s901_s1, 4  ;;  %s727_s24 = smov [#allocation6]   ;;  %s153_s22 = int_to_ptr.hbm [resolvable:$true] %s152_s22 }
   0xa   : > { %p794_p3 = pnand %p441_p0, %p138_p2  ;;  %s154_s25 = sshll.u32 %s727_s24, 4  ;;  %s155_s25 = int_to_ptr.vmem [resolvable:$true] %s154_s25 }
   0xb   : > { %p444_p6 = scmp.ge.s32.totalorder %s725_s17, 2  ;;  %s167_s28 = sshll.u32 %s902_s2, 4  ;;  %s168_s28 = int_to_ptr.hbm [resolvable:$true] %s167_s28 }
   0xc   : > { %p469_p4 = pneg %p794_p3  ;;  %s728_s29 = smov 128  }
   0xd   : > { %s729_s30 = smov 8   ;;  %s730_s4 = smov [#allocation8]  }
   0xe   : > { %p470_p5 = pnand %p469_p4, %p786_p1  ;;  %s169_s5 = sshll.u32 %s730_s4, 4  ;;  %s170_s5 = int_to_ptr.vmem [resolvable:$true] %s169_s5 }
   0xf   : > { %s32_s6 = sadd.s32 1, %s721_s16  ;;  %s440_s7 = sadd.s32 4294967294, %s725_s17  }
  0x10   : > { %472 = dma.hbm_to_vmem [thread:$0]  (!%p470_p5), %s153_s22, 512, %s155_s25, [#allocation7], %s728_s29, %s728_s29, %s729_s30  }
  0x11   : > { %475 = dma.hbm_to_vmem [thread:$0]  (!%p470_p5), %s168_s28, 64, %s170_s5, [#allocation7]  }
  0x12   : > { %p34_p7 = scmp.ge.s32.totalorder %s32_s6, 2  ;;  %s41_s8 = sadd.s32 1, %s713_s14 }
  0x13   : > { %p48_p8 = scmp.ne.s32.totalorder %s713_s14, %s709_s13  ;;  %p49_p9 = scmp.eq.s32.totalorder %s725_s17, 0 }
  0x14   : > { %s915_s6 = smov (%p34_p7, %s32_s6), 0  ;;  %p54_p10 = scmp.ne.s32.totalorder %s709_s13, %s705_s12 }
  0x15   : > { %s36_s9 = ssub.s32 %s721_s16, %s915_s6  ;;  %p125_p11 = scmp.eq.s32.totalorder %s439_s18, 1 }
  0x16   : > { %p39_p12 = scmp.eq.s32.totalorder %s36_s9, 0  ;;  %p822_p13 = por %p786_p1, %p54_p10 }
  0x17   : > { %p826_p0 = por %p125_p11, %p48_p8  ;;  %p131_p2 = scmp.eq.s32.totalorder %s440_s7, 1 }
  0x18   : > { %s831_s20 = scalar_select %p39_p12, %s713_s14, %s41_s8  }
  0x19   : > { %p50_p4 = por %p49_p9, %p48_p8  ;;  %p833_p5 = por %p131_p2, %p54_p10 }
  0x1a   : > { %s180_s22 = sand.u32 1, %s713_s14   ;;  %s446_s18 = sshll.u32 %s721_s16, 3 }
  0x1b   : > { %p486_p7 = scmp.lt.s32.totalorder %s725_s17, 2  ;;  %s445_s24 = sshll.u32 %s180_s22, 3 }
  0x1c   : > { %s189_s27 = scalar_lea.hbm %s900_s0, %s446_s18  ;;  %s184_s29 = scalar_lea.vmem [#allocation3], %s445_s24 }
  0x1d   : > { %s191_s28 = sshll.u32 %s189_s27, 4  ;;  %s193_s30 = sshll.u32 %s184_s29, 4  ;;  %s192_s28 = int_to_ptr.hbm [resolvable:$true] %s191_s28  ;;  %s194_s30 = int_to_ptr.vmem [resolvable:$true] %s193_s30 }
  0x1e   : > { %p477_p11 = pnand %p486_p7, %p50_p4  ;;  %s181_s4 = scalar_lea.sflag [#allocation4], %s180_s22 }
  0x1f   : > { %202 = sbr.rel (%p794_p3) target bundleno = 341 (0x155), region = 32  ;;  %s846_s5 = sand.u32 (!%p794_p3), 1, %s709_s13  }
  0x20   : > { %479 = dma.hbm_to_vmem [thread:$0]  (!%p477_p11), %s192_s28, 128, %s194_s30, %s181_s4  }
  0x21   : > { %s448_s7 = sshll.u32 (!%p794_p3), %s846_s5, 3  ;;  %s205_s8 = scalar_lea.sflag (!%p794_p3), [#allocation4], %s846_s5 }
  0x22   : > { %s208_s9 = scalar_lea.vmem (!%p794_p3), [#allocation3], %s448_s7 }
  0x24   : > { %692 = dma.done.wait (%p822_p13), %s205_s8, 128  }
  0x25   : > { %694 = vsyncadd (%p822_p13), %s205_s8, 4294967168 }
  0x26   : > { %696 = dma.done.wait (%p786_p1), [#allocation7], 576  }
  0x27   : > { %698 = vsyncadd (%p786_p1), [#allocation7], 4294966720  ;;  %v253_v0 = vld [vmem:[#allocation6 + $0x18] sm:$0xff]  ;;  %v252_v1 = vld [vmem:[#allocation6 + $0x10] sm:$0xff]  ;;  %vm254_vm0 = vcmask 261120   ;;  %v731_v10 = vmov 128.0  }
  0x28   : > { %270 = vmatpush.msra.mxu0 %v253_v0  ;;  %v251_v2 = vld [vmem:[#allocation6 + $0x8] sm:$0xff]  ;;  %v250_v3 = vld [vmem:[#allocation6] sm:$0xff]  ;;  %v249_v4 = vld [vmem:[%s208_s9] sm:$0xff]  ;;  %543 = vrcp.f32 %v731_v10  ;;  %s454_s19 = sshll.u32 %s717_s15, 3  ;;  %s241_s18 = scalar_lea.vmem [#allocation9], %s448_s7 }
  0x29   : > { %v283_v5 = vld [vmem:[#allocation8] sm:$0x7]  ;;  %s334_s22 = scalar_lea.hbm %s903_s3, %s454_s19  ;;  %s336_s24 = sshll.u32 %s241_s18, 4  ;;  %s337_s24 = int_to_ptr.vmem [resolvable:$true] %s336_s24 }
  0x2a   : > { %271 = vmatpush.msra.mxu0 %v252_v1  ;;  %v285_v6 = vperm.slane %v283_v5, 0  ;;  %v317_v31 = vperm.slane %v283_v5, 1  ;;  %v319_v34 = vperm.slane %v283_v5, 2  ;;  %s338_s25 = sshll.u32 %s334_s22, 4  ;;  %s324_s26 = scalar_lea.sflag [#allocation5], %s846_s5  ;;  %s339_s25 = int_to_ptr.hbm [resolvable:$true] %s338_s25 }
  0x2b   : > { %s653_s27 = sshra.s32 %s339_s25, 4  ;;  %s659_s30 = scalar_lea.hbm %s903_s3, 16  ;;  %s654_s27 = int_to_ptr.hbm [resolvable:$true] %s653_s27 }
  0x2c   : > { %272 = vmatpush.msra.mxu0 %v251_v2  ;;  %s655_s28 = scalar_lea.hbm %s654_s27, 8  ;;  %p660_p9 = scmp.lt.s32.totalorder %s654_s27, %s903_s3 }
  0x2d   : > { %p656_p1 = scmp.ne.s32.totalorder %s654_s27, %s655_s28  ;;  %p661_p10 = scmp.lt.s32.totalorder %s659_s30, %s655_s28 }
  0x2e   : > { %273 = vmatpush.msra.mxu0 %v250_v3  ;;  %v544_v11 = vpop.eup %543 }
  0x2f   : > { %452 = vmatmul.msk.f32.vlgmr.msra.gmra.mxu0 %vm254_vm0, %v249_v4  ;;  %v290_v12 = vmul.f32 128.0, %v544_v11  ;;  %vm294_vm1 = vweird.f32 %v544_v11  ;;  %p657_p3 = pnand %p656_p1, %p826_p0  ;;  %p662_p12 = por %p661_p10, %p660_p9 }
  0x31   : > { %v291_v13 = vsub.f32 1.0, %v290_v12  ;;  %p658_p8 = pneg %p657_p3 }
  0x33   : > { %v292_v14 = vmul.f32 %v544_v11, %v291_v13  ;;  %p663_p13 = pnand %p662_p12, %p658_p8 }
  0x35   : > { %v293_v15 = vadd.f32 %v544_v11, %v292_v14 }
  0x37   : > { %v295_v17 = vsel %vm294_vm1, %v544_v11, %v293_v15 }
  0xac   : > { %v275_v7 = vpop.f32.mrf.mxu0 }
  0xad   : > { %v286_v8 = vadd.f32 %v285_v6, %v275_v7 }
  0xaf   : > { %287 = vadd.xlane.f32.xlu0 %v286_v8  ;;  %v297_v9 = vmul.f32 %v286_v8, %v286_v8 }
  0xb7   : > { %298 = vadd.xlane.f32.xlu0 %v297_v9 }
 0x122   : > { %v288_v16 = vpop.xlane.xlu0 %287 }
 0x123   : > { %v296_v18 = vmul.f32 %v295_v17, %v288_v16 }
 0x125   : > { %v301_v20 = vmul.f32 %v296_v18, %v296_v18  ;;  %v304_v32 = vsub.f32 %v286_v8, %v296_v18 }
 0x12a   : > { %v299_v19 = vpop.xlane.xlu0 %298 }
 0x12b   : > { %v300_v21 = vmul.f32 %v299_v19, %v295_v17 }
 0x12d   : > { %v302_v22 = vsub.f32 %v300_v21, %v301_v20 }
 0x12f   : > { %v303_v23 = vmax.f32 %v302_v22, 0.0 }
 0x131   : > { %v305_v24 = vadd.f32 1e-05, %v303_v23 }
 0x133   : > { %545 = vrsqrt.f32 %v305_v24  ;;  %vm312_vm3 = vweird.f32 %v305_v24 }
 0x139   : > { %v546_v25 = vpop.eup %545 }
 0x13a   : > { %v307_v26 = vmul.f32 %v546_v25, %v305_v24  ;;  %vm313_vm2 = vweird.f32 %v546_v25 }
 0x13b   : > { %vm314_vm4 = vmor %vm312_vm3, %vm313_vm2 }
 0x13c   : > { %v308_v27 = vmul.f32 %v546_v25, %v307_v26 }
 0x13e   : > { %v309_v28 = vmul.f32 0.5, %v308_v27 }
 0x140   : > { %v310_v29 = vsub.f32 1.5, %v309_v28 }
 0x142   : > { %v311_v30 = vmul.f32 %v546_v25, %v310_v29 }
 0x144   : > { %v315_v33 = vsel %vm314_vm4, %v546_v25, %v311_v30 }
 0x145   : > { %v316_v35 = vmul.f32 %v315_v33, %v304_v32 }
 0x147   : > { %v318_v36 = vmul.f32 %v317_v31, %v316_v35 }
 0x149   : > { %v320_v37 = vadd.f32 %v319_v34, %v318_v36 }
 0x14b   : > { %547 = vtanh.f32 %v320_v37 }
 0x151   : > { %v548_v38 = vpop.eup %547 }
 0x152   : > { %322 = vst [vmem:[%s241_s18] sm:$0xff] %v548_v38 }
 0x153   : > { %666 = shalt.err (!%p663_p13)
}
 0x154   : > { %467 = dma.vmem_to_hbm [thread:$0]  (%p826_p0), %s337_s24, 128, %s339_s25, %s324_s26  }
 0x155 PF: > { %s350_s5 = sand.u32 1, %s705_s12   ;;  %p481_p2 = pnand %p444_p6, %p833_p5 }
 0x156   : > { %s351_s8 = scalar_lea.sflag [#allocation5], %s350_s5 }
 0x157   : > { %p482_p4 = pneg %p481_p2 }
 0x159   : > { %700 = dma.done.wait (%p482_p4), %s351_s8, 128  }
 0x15a   : > { %702 = vsyncadd (%p482_p4), %s351_s8, 4294967168  ;;  %s20_s17 = sadd.s32 1, %s725_s17   ;;  %s909_s12 = smov %s709_s13 }
 0x15b   : > { %p17_p7 = scmp.ge.s32.totalorder %s20_s17, 4   ;;  %s910_s13 = smov %s713_s14 }
 0x15c   : > { %s911_s14 = smov %s831_s20  ;;  %s912_s15 = smov %s721_s16 }
 0x15d   : > { %s913_s16 = smov %s915_s6  ;;  %19 = sbr.rel (!%p17_p7) target bundleno = 7 (0x7), region = 94 }
 0x162   :  { %357 = vsyncpa [#allocation4], 1 }
 0x163   :  { %359 = vsyncpa [#allocation4 + $0x1], 1 }
 0x164   :  { %360 = vsyncpa [#allocation7], 1 }
 0x165   :  { %361 = vsyncpa [#allocation5], 1 }
 0x166   :  { %363 = vsyncpa [#allocation5 + $0x1], 1 }

// kernel: tpu_custom_call.1
= control target key start
LH: loop header
LB: loop body
LE: loop exit
PB: predicated region body
PF: predicated region fallthrough
CT: control target
= control target key end

     0   :  { %8 = vsyncpa [#allocation4], 0  ;;  %s900_s0 = inlined_call_operand.hbm [shape: f32[16,32], index: 0, kind: input, shape index: {}]   ;;  %s901_s1 = inlined_call_operand.hbm [shape: f32[32,128], index: 1, kind: input, shape index: {}]   ;;  %s902_s2 = inlined_call_operand.hbm [shape: f32[3,128], index: 2, kind: input, shape index: {}]   ;;  %s903_s3 = inlined_call_operand.hbm [shape: f32[16,128], index: 3, kind: output, shape index: {}]  }
   0x1   :  { %10 = vsyncpa [#allocation4 + $0x1], 0 }
   0x2   :  { %11 = vsyncpa [#allocation7], 0 }
   0x3   :  { %12 = vsyncpa [#allocation5], 0 }
   0x4   :  { %14 = vsyncpa [#allocation5 + $0x1], 0  ;;  %s752_s12 = smov 0   ;;  %s754_s13 = smov 0  }
   0x5   :  { %s756_s14 = smov 0   ;;  %s758_s15 = smov 0  }
   0x6   :  { %s760_s16 = smov 0   ;;  %s762_s17 = smov 0  }
   0x7 LB: > { %s439_s18 = sadd.s32 4294967295, %s725_s17   ;;  %p441_p0 = scmp.ge.s32.totalorder %s725_s17, 1  ;;  %s725_s17 = sphi %s762_s17, %s20_s17   ;;  %s721_s16 = sphi %s760_s16, %s913_s16   ;;  %s717_s15 = sphi %s758_s15, %s912_s15   ;;  %s713_s14 = sphi %s756_s14, %s911_s14   ;;  %s709_s13 = sphi %s754_s13, %s910_s13   ;;  %s705_s12 = sphi %s752_s12, %s909_s12  }
   0x8   : > { %p786_p1 = scmp.eq.s32.totalorder %s439_s18, 0  ;;  %p138_p2 = scmp.lt.s32.totalorder %s725_s17, 3 }
   0x9   : > { %s152_s22 = sshll.u32 %s901_s1, 4  ;;  %s727_s24 = smov [#allocation6]   ;;  %s153_s22 = int_to_ptr.hbm [resolvable:$true] %s152_s22 }
   0xa   : > { %p794_p3 = pnand %p441_p0, %p138_p2  ;;  %s154_s25 = sshll.u32 %s727_s24, 4  ;;  %s155_s25 = int_to_ptr.vmem [resolvable:$true] %s154_s25 }
   0xb   : > { %p444_p6 = scmp.ge.s32.totalorder %s725_s17, 2  ;;  %s167_s28 = sshll.u32 %s902_s2, 4  ;;  %s168_s28 = int_to_ptr.hbm [resolvable:$true] %s167_s28 }
   0xc   : > { %p469_p4 = pneg %p794_p3  ;;  %s728_s29 = smov 128  }
   0xd   : > { %s729_s30 = smov 8   ;;  %s730_s4 = smov [#allocation8]  }
   0xe   : > { %p470_p5 = pnand %p469_p4, %p786_p1  ;;  %s169_s5 = sshll.u32 %s730_s4, 4  ;;  %s170_s5 = int_to_ptr.vmem [resolvable:$true] %s169_s5 }
   0xf   : > { %s32_s6 = sadd.s32 1, %s721_s16  ;;  %s440_s7 = sadd.s32 4294967294, %s725_s17  }
  0x10   : > { %472 = dma.hbm_to_vmem [thread:$0]  (!%p470_p5), %s153_s22, 512, %s155_s25, [#allocation7], %s728_s29, %s728_s29, %s729_s30  }
  0x11   : > { %475 = dma.hbm_to_vmem [thread:$0]  (!%p470_p5), %s168_s28, 64, %s170_s5, [#allocation7]  }
  0x12   : > { %p34_p7 = scmp.ge.s32.totalorder %s32_s6, 2  ;;  %s41_s8 = sadd.s32 1, %s713_s14 }
  0x13   : > { %p48_p8 = scmp.ne.s32.totalorder %s713_s14, %s709_s13  ;;  %p49_p9 = scmp.eq.s32.totalorder %s725_s17, 0 }
  0x14   : > { %s915_s6 = smov (%p34_p7, %s32_s6), 0  ;;  %p54_p10 = scmp.ne.s32.totalorder %s709_s13, %s705_s12 }
  0x15   : > { %s36_s9 = ssub.s32 %s721_s16, %s915_s6  ;;  %p125_p11 = scmp.eq.s32.totalorder %s439_s18, 1 }
  0x16   : > { %p39_p12 = scmp.eq.s32.totalorder %s36_s9, 0  ;;  %p822_p13 = por %p786_p1, %p54_p10 }
  0x17   : > { %p826_p0 = por %p125_p11, %p48_p8  ;;  %p131_p2 = scmp.eq.s32.totalorder %s440_s7, 1 }
  0x18   : > { %s831_s20 = scalar_select %p39_p12, %s713_s14, %s41_s8  }
  0x19   : > { %p50_p4 = por %p49_p9, %p48_p8  ;;  %p833_p5 = por %p131_p2, %p54_p10 }
  0x1a   : > { %s180_s22 = sand.u32 1, %s713_s14   ;;  %s446_s18 = sshll.u32 %s721_s16, 3 }
  0x1b   : > { %p486_p7 = scmp.lt.s32.totalorder %s725_s17, 2  ;;  %s445_s24 = sshll.u32 %s180_s22, 3 }
  0x1c   : > { %s189_s27 = scalar_lea.hbm %s900_s0, %s446_s18  ;;  %s184_s29 = scalar_lea.vmem [#allocation3], %s445_s24 }
  0x1d   : > { %s191_s28 = sshll.u32 %s189_s27, 4  ;;  %s193_s30 = sshll.u32 %s184_s29, 4  ;;  %s192_s28 = int_to_ptr.hbm [resolvable:$true] %s191_s28  ;;  %s194_s30 = int_to_ptr.vmem [resolvable:$true] %s193_s30 }
  0x1e   : > { %p477_p11 = pnand %p486_p7, %p50_p4  ;;  %s181_s4 = scalar_lea.sflag [#allocation4], %s180_s22 }
  0x1f   : > { %202 = sbr.rel (%p794_p3) target bundleno = 341 (0x155), region = 32  ;;  %s846_s5 = sand.u32 (!%p794_p3), 1, %s709_s13  }
  0x20   : > { %479 = dma.hbm_to_vmem [thread:$0]  (!%p477_p11), %s192_s28, 128, %s194_s30, %s181_s4  }
  0x21   : > { %s448_s7 = sshll.u32 (!%p794_p3), %s846_s5, 3  ;;  %s205_s8 = scalar_lea.sflag (!%p794_p3), [#allocation4], %s846_s5 }
  0x22   : > { %s208_s9 = scalar_lea.vmem (!%p794_p3), [#allocation3], %s448_s7 }
  0x24   : > { %692 = dma.done.wait (%p822_p13), %s205_s8, 128  }
  0x25   : > { %694 = vsyncadd (%p822_p13), %s205_s8, 4294967168 }
  0x26   : > { %696 = dma.done.wait (%p786_p1), [#allocation7], 576  }
  0x27   : > { %698 = vsyncadd (%p786_p1), [#allocation7], 4294966720  ;;  %v253_v0 = vld [vmem:[#allocation6 + $0x18] sm:$0xff]  ;;  %v252_v1 = vld [vmem:[#allocation6 + $0x10] sm:$0xff]  ;;  %vm254_vm0 = vcmask 261120   ;;  %v731_v10 = vmov 128.0  }
  0x28   : > { %270 = vmatpush.msra.mxu0 %v253_v0  ;;  %v251_v2 = vld [vmem:[#allocation6 + $0x8] sm:$0xff]  ;;  %v250_v3 = vld [vmem:[#allocation6] sm:$0xff]  ;;  %v249_v4 = vld [vmem:[%s208_s9] sm:$0xff]  ;;  %543 = vrcp.f32 %v731_v10  ;;  %s454_s19 = sshll.u32 %s717_s15, 3  ;;  %s241_s18 = scalar_lea.vmem [#allocation9], %s448_s7 }
  0x29   : > { %v283_v5 = vld [vmem:[#allocation8] sm:$0x7]  ;;  %s334_s22 = scalar_lea.hbm %s903_s3, %s454_s19  ;;  %s336_s24 = sshll.u32 %s241_s18, 4  ;;  %s337_s24 = int_to_ptr.vmem [resolvable:$true] %s336_s24 }
  0x2a   : > { %271 = vmatpush.msra.mxu0 %v252_v1  ;;  %v285_v6 = vperm.slane %v283_v5, 0  ;;  %v317_v31 = vperm.slane %v283_v5, 1  ;;  %v319_v34 = vperm.slane %v283_v5, 2  ;;  %s338_s25 = sshll.u32 %s334_s22, 4  ;;  %s324_s26 = scalar_lea.sflag [#allocation5], %s846_s5  ;;  %s339_s25 = int_to_ptr.hbm [resolvable:$true] %s338_s25 }
  0x2b   : > { %s653_s27 = sshra.s32 %s339_s25, 4  ;;  %s659_s30 = scalar_lea.hbm %s903_s3, 16  ;;  %s654_s27 = int_to_ptr.hbm [resolvable:$true] %s653_s27 }
  0x2c   : > { %272 = vmatpush.msra.mxu0 %v251_v2  ;;  %s655_s28 = scalar_lea.hbm %s654_s27, 8  ;;  %p660_p9 = scmp.lt.s32.totalorder %s654_s27, %s903_s3 }
  0x2d   : > { %p656_p1 = scmp.ne.s32.totalorder %s654_s27, %s655_s28  ;;  %p661_p10 = scmp.lt.s32.totalorder %s659_s30, %s655_s28 }
  0x2e   : > { %273 = vmatpush.msra.mxu0 %v250_v3  ;;  %v544_v11 = vpop.eup %543 }
  0x2f   : > { %452 = vmatmul.msk.f32.vlgmr.msra.gmra.mxu0 %vm254_vm0, %v249_v4  ;;  %v290_v12 = vmul.f32 128.0, %v544_v11  ;;  %vm294_vm1 = vweird.f32 %v544_v11  ;;  %p657_p3 = pnand %p656_p1, %p826_p0  ;;  %p662_p12 = por %p661_p10, %p660_p9 }
  0x31   : > { %v291_v13 = vsub.f32 1.0, %v290_v12  ;;  %p658_p8 = pneg %p657_p3 }
  0x33   : > { %v292_v14 = vmul.f32 %v544_v11, %v291_v13  ;;  %p663_p13 = pnand %p662_p12, %p658_p8 }
  0x35   : > { %v293_v15 = vadd.f32 %v544_v11, %v292_v14 }
  0x37   : > { %v295_v17 = vsel %vm294_vm1, %v544_v11, %v293_v15 }
  0xac   : > { %v275_v7 = vpop.f32.mrf.mxu0 }
  0xad   : > { %v286_v8 = vadd.f32 %v285_v6, %v275_v7 }
  0xaf   : > { %287 = vadd.xlane.f32.xlu0 %v286_v8  ;;  %v297_v9 = vmul.f32 %v286_v8, %v286_v8 }
  0xb7   : > { %298 = vadd.xlane.f32.xlu0 %v297_v9 }
 0x122   : > { %v288_v16 = vpop.xlane.xlu0 %287 }
 0x123   : > { %v296_v18 = vmul.f32 %v295_v17, %v288_v16 }
 0x125   : > { %v301_v20 = vmul.f32 %v296_v18, %v296_v18  ;;  %v304_v32 = vsub.f32 %v286_v8, %v296_v18 }
 0x12a   : > { %v299_v19 = vpop.xlane.xlu0 %298 }
 0x12b   : > { %v300_v21 = vmul.f32 %v299_v19, %v295_v17 }
 0x12d   : > { %v302_v22 = vsub.f32 %v300_v21, %v301_v20 }
 0x12f   : > { %v303_v23 = vmax.f32 %v302_v22, 0.0 }
 0x131   : > { %v305_v24 = vadd.f32 1e-05, %v303_v23 }
 0x133   : > { %545 = vrsqrt.f32 %v305_v24  ;;  %vm312_vm3 = vweird.f32 %v305_v24 }
 0x139   : > { %v546_v25 = vpop.eup %545 }
 0x13a   : > { %v307_v26 = vmul.f32 %v546_v25, %v305_v24  ;;  %vm313_vm2 = vweird.f32 %v546_v25 }
 0x13b   : > { %vm314_vm4 = vmor %vm312_vm3, %vm313_vm2 }
 0x13c   : > { %v308_v27 = vmul.f32 %v546_v25, %v307_v26 }
 0x13e   : > { %v309_v28 = vmul.f32 0.5, %v308_v27 }
 0x140   : > { %v310_v29 = vsub.f32 1.5, %v309_v28 }
 0x142   : > { %v311_v30 = vmul.f32 %v546_v25, %v310_v29 }
 0x144   : > { %v315_v33 = vsel %vm314_vm4, %v546_v25, %v311_v30 }
 0x145   : > { %v316_v35 = vmul.f32 %v315_v33, %v304_v32 }
 0x147   : > { %v318_v36 = vmul.f32 %v317_v31, %v316_v35 }
 0x149   : > { %v320_v37 = vadd.f32 %v319_v34, %v318_v36 }
 0x14b   : > { %547 = vtanh.f32 %v320_v37 }
 0x151   : > { %v548_v38 = vpop.eup %547 }
 0x152   : > { %322 = vst [vmem:[%s241_s18] sm:$0xff] %v548_v38 }
 0x153   : > { %666 = shalt.err (!%p663_p13)
}
 0x154   : > { %467 = dma.vmem_to_hbm [thread:$0]  (%p826_p0), %s337_s24, 128, %s339_s25, %s324_s26  }
 0x155 PF: > { %s350_s5 = sand.u32 1, %s705_s12   ;;  %p481_p2 = pnand %p444_p6, %p833_p5 }
 0x156   : > { %s351_s8 = scalar_lea.sflag [#allocation5], %s350_s5 }
 0x157   : > { %p482_p4 = pneg %p481_p2 }
 0x159   : > { %700 = dma.done.wait (%p482_p4), %s351_s8, 128  }
 0x15a   : > { %702 = vsyncadd (%p482_p4), %s351_s8, 4294967168  ;;  %s20_s17 = sadd.s32 1, %s725_s17   ;;  %s909_s12 = smov %s709_s13 }
 0x15b   : > { %p17_p7 = scmp.ge.s32.totalorder %s20_s17, 4   ;;  %s910_s13 = smov %s713_s14 }
 0x15c   : > { %s911_s14 = smov %s831_s20  ;;  %s912_s15 = smov %s721_s16 }
 0x15d   : > { %s913_s16 = smov %s915_s6  ;;  %19 = sbr.rel (!%p17_p7) target bundleno = 7 (0x7), region = 94 }
 0x162   :  { %357 = vsyncpa [#allocation4], 1 }
 0x163   :  { %359 = vsyncpa [#allocation4 + $0x1], 1 }
 0x164   :  { %360 = vsyncpa [#allocation7], 1 }
 0x165   :  { %361 = vsyncpa [#allocation5], 1 }
 0x166   :  { %363 = vsyncpa [#allocation5 + $0x1], 1 }

</bundles_post_ra>
